<compile_context>
chip_gen: v7x
topology: tpu7x:2x2x1
jax: 0.10.0
libtpu: 0.0.40
codegen_flags: <defaults>
</compile_context>

<pallas_src>
import numpy as np
import jax
import jax.numpy as jnp
from jax.experimental import pallas as pl
from jax.experimental.pallas import tpu as pltpu

# ----------------------------- configuration ------------------------------
N_BITS = 4                      # cfg.MODEL.OFFSET.N_BITS
N_BINS = 2.0 ** N_BITS

B, C_IN, D, H32, W32 = 2, 16, 2, 4, 4     # feat_map_32x: (B, C_IN, D, 4, 4) in NCDHW
C_MID = C_IN // 4
C_OUT = 3
UP = 8                                     # upsample 32x -> 4x level
H4, W4 = H32 * UP, W32 * UP                # 32 x 32
POOL = 4                                   # two (1,2,2) avg pools
HP, WP = H4 // POOL, W4 // POOL            # 8 x 8
BD = B * D
S32 = H32 * W32                            # 16   (spatial at 32x level)
S4 = H4 * W4                               # 1024 (spatial at 4x level)
SP = HP * WP                               # 64   (pooled spatial)


# ---------------------- glue: fixed interpolation / pool matrices ---------
def _interp_matrix(out_size: int, in_size: int) -> np.ndarray:
    """Linear-interp matrix matching torch Upsample(align_corners=False)."""
    scale = in_size / out_size
    i = np.arange(out_size, dtype=np.float64)
    src = (i + 0.5) * scale - 0.5
    src = np.maximum(src, 0.0)              # torch clamps negative source coords
    i0 = np.floor(src).astype(np.int64)
    i0 = np.minimum(i0, in_size - 1)
    i1 = np.minimum(i0 + 1, in_size - 1)
    lam = src - i0
    m = np.zeros((out_size, in_size), dtype=np.float32)
    m[np.arange(out_size), i0] += (1.0 - lam).astype(np.float32)
    m[np.arange(out_size), i1] += lam.astype(np.float32)
    return m


def _pool_matrix(in_size: int, factor: int) -> np.ndarray:
    """Non-overlapping average pooling as a matrix (== stacked 2x2 avg pools)."""
    out_size = in_size // factor
    m = np.zeros((out_size, in_size), dtype=np.float32)
    for r in range(out_size):
        m[r, r * factor:(r + 1) * factor] = 1.0 / factor
    return m


# ------------------------------- Pallas kernel -----------------------------
def offset_decoder_kernel(x_ref, wblk_ref, u_ref, pu_ref, b_ref,
                          offset_ref, out_ref):
    """One grid step = one batch element, all D depth slices fused.

    Channel-major, lane-dense layout (spatial axis on lanes):
      x_ref      : (1, D*C_IN, S32)   = (1, 32, 16)   depth slices stacked on sublanes
      wblk_ref   : (D*C_OUT, D*C_IN)  = (6, 32)       blockdiag_D((w1 @ w2)^T)
      u_ref      : (S32, S4)          = (16, 1024)    U^T      (bilinear upsample)
      pu_ref     : (S32, SP)          = (16, 64)      (P @ U)^T (pool after upsample)
      b_ref      : (D*C_OUT, 1)       = (6, 1)        tiled (b1 @ w2 + b2)^T
      offset_ref : (1, D*C_OUT, S4)   = (1, 6, 1024)
      out_ref    : (1, D*C_OUT, SP)   = (1, 6, 64)
    """
    bias = b_ref[...]                                              # (6, 1), lane-broadcast

    # folded 1x1x1 convs for every depth slice in one matmul: rows = (d, c_out)
    sT = jnp.dot(wblk_ref[...], x_ref[0],
                 preferred_element_type=jnp.float32)               # (6, 16)

    # offset = U @ (x @ W12) + b12  ->  lane-dense (6, 1024) store
    offset_ref[0] = (
        jnp.dot(sT, u_ref[...], preferred_element_type=jnp.float32) + bias)

    # pooled = (P @ U) @ (x @ W12) + b12  (pool rows sum to 1 -> bias passes)
    pooled = jnp.dot(sT, pu_ref[...], preferred_element_type=jnp.float32) + bias

    v = jax.nn.sigmoid(pooled) * 255.0
    if N_BITS < 8:
        v = jnp.floor(v / (2.0 ** (8 - N_BITS)))
    out_ref[0] = v / N_BINS - 0.5


def offset_decoder_forward(feat_maps, kernel_params):
    """feat_maps: tuple of 4 NDHWC tensors (only the 32x map is used, as in torch).

    kernel_params: (w_blk, uT, puT, b_blk) pre-folded on the host.
    Returns (offset, out) in NDHWC layout.
    """
    assert len(feat_maps) == 4, "Expected 4 feature maps, got {}".format(len(feat_maps))
    feat_32x = feat_maps[0]                        # (B, D, H32, W32, C_IN)
    w_blk, uT, puT, b_blk = kernel_params

    # channel-major per slice, depth slices stacked along sublanes:
    # (B, D, H32, W32, C) -> (B, D*C_IN, H32*W32); spatial goes on lanes.
    x_cm = (feat_32x.reshape(B, D, S32, C_IN)
            .transpose(0, 1, 3, 2)
            .reshape(B, D * C_IN, S32))

    grid_spec = pltpu.PrefetchScalarGridSpec(
        num_scalar_prefetch=0,
        grid=(B,),
        in_specs=[
            pl.BlockSpec((1, D * C_IN, S32), lambda b: (b, 0, 0)),
            pl.BlockSpec((D * C_OUT, D * C_IN), lambda b: (0, 0)),
            pl.BlockSpec((S32, S4), lambda b: (0, 0)),
            pl.BlockSpec((S32, SP), lambda b: (0, 0)),
            pl.BlockSpec((D * C_OUT, 1), lambda b: (0, 0)),
        ],
        out_specs=[
            pl.BlockSpec((1, D * C_OUT, S4), lambda b: (b, 0, 0)),
            pl.BlockSpec((1, D * C_OUT, SP), lambda b: (b, 0, 0)),
        ],
    )

    offset_cm, out_cm = pl.pallas_call(
        offset_decoder_kernel,
        out_shape=(
            jax.ShapeDtypeStruct((B, D * C_OUT, S4), jnp.float32),
            jax.ShapeDtypeStruct((B, D * C_OUT, SP), jnp.float32),
        ),
        grid_spec=grid_spec,
        compiler_params=pltpu.CompilerParams(dimension_semantics=("parallel",)),
    )(x_cm, w_blk, uT, puT, b_blk)

    # back to NDHWC for the caller (rows within a block are ordered (d, c_out))
    offset = offset_cm.reshape(B, D, C_OUT, H4, W4).transpose(0, 1, 3, 4, 2)
    out = out_cm.reshape(B, D, C_OUT, HP, WP).transpose(0, 1, 3, 4, 2)
    return offset, out


# ------------------------------ reference (pure JAX, unfolded) --------------
def offset_decoder_reference(feat_32x, ref_params):
    u_mat, p_mat, w1, b1, w2, b2 = ref_params
    hp = jax.lax.Precision.HIGHEST
    x_flat = feat_32x.reshape(BD, S32, C_IN)
    up = jnp.einsum('oi,bic->boc', u_mat, x_flat, precision=hp)
    h1 = jnp.einsum('boc,cm->bom', up, w1, precision=hp) + b1
    off = jnp.einsum('bom,mk->bok', h1, w2, precision=hp) + b2
    pooled = jnp.einsum('po,bok->bpk', p_mat, off, precision=hp)
    v = jax.nn.sigmoid(pooled) * 255.0
    if N_BITS < 8:
        v = jnp.floor(v / (2.0 ** (8 - N_BITS)))
    v = v / N_BINS - 0.5
    return off.reshape(B, D, H4, W4, C_OUT), v.reshape(B, D, HP, WP, C_OUT)


# ------------------------------------ main ----------------------------------
if __name__ == "__main__":
    key = jax.random.PRNGKey(0)
    k_feat, k_w1, k_b1, k_w2, k_b2 = jax.random.split(key, 5)

    # "conv" parameters (1x1x1 Conv3d weights as channel matmuls)
    w1 = jax.random.normal(k_w1, (C_IN, C_MID), jnp.float32) / np.sqrt(C_IN)
    b1 = jax.random.uniform(k_b1, (1, C_MID), jnp.float32, -0.1, 0.1)
    w2 = jax.random.normal(k_w2, (C_MID, C_OUT), jnp.float32) / np.sqrt(C_MID)
    b2 = jax.random.uniform(k_b2, (1, C_OUT), jnp.float32, -0.1, 0.1)

    # fixed upsample / pooling matrices
    u_h = _interp_matrix(H4, H32)
    u_w = _interp_matrix(W4, W32)
    u_mat = np.kron(u_h, u_w).astype(np.float32)          # (S4, S32)
    p_h = _pool_matrix(H4, POOL)
    p_w = _pool_matrix(W4, POOL)
    p_mat = np.kron(p_h, p_w).astype(np.float32)          # (SP, S4)
    # bias folding through the pooling relies on each pool row summing to 1
    assert np.allclose(p_mat.sum(axis=1), 1.0)

    # ---- host-side algebraic folding (done in float64, cast to f32) ----
    w1_np = np.asarray(w1, np.float64)
    b1_np = np.asarray(b1, np.float64)
    w2_np = np.asarray(w2, np.float64)
    b2_np = np.asarray(b2, np.float64)
    w12 = (w1_np @ w2_np).astype(np.float32)               # (C_IN, C_OUT)
    b12 = (b1_np @ w2_np + b2_np).astype(np.float32)       # (1, C_OUT)
    pu = (p_mat.astype(np.float64) @ u_mat.astype(np.float64)).astype(np.float32)  # (SP, S32)

    # block-diagonal channel matrix so all D depth slices share one matmul
    w_blk = np.zeros((D * C_OUT, D * C_IN), np.float32)
    for d in range(D):
        w_blk[d * C_OUT:(d + 1) * C_OUT, d * C_IN:(d + 1) * C_IN] = w12.T
    b_blk = np.tile(b12.T, (D, 1)).astype(np.float32)      # (D*C_OUT, 1)

    kernel_params = (
        jnp.asarray(w_blk),        # (6, 32)
        jnp.asarray(u_mat.T),      # (16, 1024)  U^T
        jnp.asarray(pu.T),         # (16, 64)    (P @ U)^T
        jnp.asarray(b_blk),        # (6, 1)
    )

    # 4 feature maps, NDHWC; only the 32x map is consumed by forward()
    feat_32x = jax.random.normal(k_feat, (B, D, H32, W32, C_IN), jnp.float32)
    feat_16x = jnp.zeros((B, D, H32 * 2, W32 * 2, C_IN // 2), jnp.float32)
    feat_8x = jnp.zeros((B, D, H32 * 4, W32 * 4, C_IN // 4), jnp.float32)
    feat_4x = jnp.zeros((B, D, H32 * 8, W32 * 8, C_IN // 4), jnp.float32)

    offset, out = offset_decoder_forward(
        (feat_32x, feat_16x, feat_8x, feat_4x), kernel_params)
    offset = jax.block_until_ready(offset)
    out = jax.block_until_ready(out)

    # sanity check against a pure-JAX, unfolded reference
    ref_params = (jnp.asarray(u_mat), jnp.asarray(p_mat), w1, b1, w2, b2)
    ref_offset, ref_out = offset_decoder_reference(feat_32x, ref_params)

    np.testing.assert_allclose(np.asarray(offset), np.asarray(ref_offset),
                               rtol=1e-4, atol=1e-4)

    # `out` passes through floor(): f32 accumulation-order differences from the
    # host-side folding can flip a value sitting exactly on a bin edge by one
    # bin (1/16).  Allow at most one-bin deviations, and require that the vast
    # majority of elements agree exactly.
    diff = np.abs(np.asarray(out) - np.asarray(ref_out))
    assert np.all(diff <= 1.0 / N_BINS + 1e-5), "out differs by more than one bin"
    assert np.mean(diff > 1e-5) <= 0.05, "too many quantized values flipped bins"

    print("KERNEL_OK")
</pallas_src>

<mosaic_0001>
module attributes {stable_mosaic.version = 11 : i64} {
  func.func @offset_decoder_kernel(%arg0: i32, %arg1: memref<1x32x16xf32, #tpu.memory_space<vmem>>, %arg2: memref<6x32xf32, #tpu.memory_space<vmem>>, %arg3: memref<16x1024xf32, #tpu.memory_space<vmem>>, %arg4: memref<16x64xf32, #tpu.memory_space<vmem>>, %arg5: memref<6x1xf32, #tpu.memory_space<vmem>>, %arg6: memref<1x6x1024xf32, #tpu.memory_space<vmem>>, %arg7: memref<1x6x64xf32, #tpu.memory_space<vmem>>) attributes {dimension_semantics = [#tpu.dimension_semantics<parallel>], iteration_bounds = array<i64: 2>, scalar_prefetch = 0 : i64, scratch_operands = 0 : i64, tpu.core_type = #tpu.core_type<tc>, window_params = [{transform_indices = @transform_0, window_bounds = array<i64: 1, 32, 16>}, {pipeline_mode = #tpu.pipeline_mode<synchronous>, transform_indices = @transform_1, window_bounds = array<i64: 6, 32>}, {pipeline_mode = #tpu.pipeline_mode<synchronous>, transform_indices = @transform_2, window_bounds = array<i64: 16, 1024>}, {pipeline_mode = #tpu.pipeline_mode<synchronous>, transform_indices = @transform_3, window_bounds = array<i64: 16, 64>}, {pipeline_mode = #tpu.pipeline_mode<synchronous>, transform_indices = @transform_4, window_bounds = array<i64: 6, 1>}, {transform_indices = @transform_5, window_bounds = array<i64: 1, 6, 1024>}, {transform_indices = @transform_6, window_bounds = array<i64: 1, 6, 64>}]} {
    %c0 = arith.constant 0 : index
    %c0_0 = arith.constant 0 : index
    %0 = vector.load %arg5[%c0, %c0_0] : memref<6x1xf32, #tpu.memory_space<vmem>>, vector<6x1xf32>
    %c0_1 = arith.constant 0 : index
    %c0_2 = arith.constant 0 : index
    %1 = vector.load %arg2[%c0_1, %c0_2] : memref<6x32xf32, #tpu.memory_space<vmem>>, vector<6x32xf32>
    %c0_3 = arith.constant 0 : index
    %c0_4 = arith.constant 0 : index
    %c0_5 = arith.constant 0 : index
    %2 = vector.load %arg1[%c0_3, %c0_4, %c0_5] : memref<1x32x16xf32, #tpu.memory_space<vmem>>, vector<1x32x16xf32>
    %3 = vector.shape_cast %2 : vector<1x32x16xf32> to vector<32x16xf32>
    %cst = arith.constant dense<0.000000e+00> : vector<6x16xf32>
    %4 = tpu.matmul %1, %3, %cst {dimension_numbers = #tpu.dot_dimension_numbers<[1], [0], [0], [1], [0, 0, 1, 1], [], []>} : vector<6x32xf32>, vector<32x16xf32>, vector<6x16xf32> -> vector<6x16xf32>
    %c0_6 = arith.constant 0 : index
    %c0_7 = arith.constant 0 : index
    %5 = vector.load %arg3[%c0_6, %c0_7] : memref<16x1024xf32, #tpu.memory_space<vmem>>, vector<16x1024xf32>
    %cst_8 = arith.constant dense<0.000000e+00> : vector<6x1024xf32>
    %6 = tpu.matmul %4, %5, %cst_8 {dimension_numbers = #tpu.dot_dimension_numbers<[1], [0], [0], [1], [0, 0, 1, 1], [], []>} : vector<6x16xf32>, vector<16x1024xf32>, vector<6x1024xf32> -> vector<6x1024xf32>
    %7 = vector.broadcast %0 : vector<6x1xf32> to vector<6x1024xf32>
    %8 = arith.addf %6, %7 : vector<6x1024xf32>
    %c0_9 = arith.constant 0 : index
    %c0_10 = arith.constant 0 : index
    %c0_11 = arith.constant 0 : index
    %9 = vector.load %arg6[%c0_9, %c0_10, %c0_11] : memref<1x6x1024xf32, #tpu.memory_space<vmem>>, vector<1x6x1024xf32>
    %10 = vector.shape_cast %9 : vector<1x6x1024xf32> to vector<6x1024xf32>
    %11 = vector.shape_cast %8 : vector<6x1024xf32> to vector<1x6x1024xf32>
    tpu.vector_store %arg6[%c0_9, %c0_10, %c0_11], %11 {strides = array<i32>} : memref<1x6x1024xf32, #tpu.memory_space<vmem>>, vector<1x6x1024xf32>,
    %c0_12 = arith.constant 0 : index
    %c0_13 = arith.constant 0 : index
    %12 = vector.load %arg4[%c0_12, %c0_13] : memref<16x64xf32, #tpu.memory_space<vmem>>, vector<16x64xf32>
    %cst_14 = arith.constant dense<0.000000e+00> : vector<6x64xf32>
    %13 = tpu.matmul %4, %12, %cst_14 {dimension_numbers = #tpu.dot_dimension_numbers<[1], [0], [0], [1], [0, 0, 1, 1], [], []>} : vector<6x16xf32>, vector<16x64xf32>, vector<6x64xf32> -> vector<6x64xf32>
    %14 = vector.broadcast %0 : vector<6x1xf32> to vector<6x64xf32>
    %15 = arith.addf %13, %14 : vector<6x64xf32>
    %16 = arith.negf %15 : vector<6x64xf32>
    %17 = math.exp %16 : vector<6x64xf32>
    %cst_15 = arith.constant 1.000000e+00 : f32
    %18 = vector.broadcast %cst_15 : f32 to vector<6x64xf32>
    %19 = arith.addf %18, %17 : vector<6x64xf32>
    %20 = arith.divf %18, %19 : vector<6x64xf32>
    %cst_16 = arith.constant 2.550000e+02 : f32
    %21 = vector.broadcast %cst_16 : f32 to vector<6x64xf32>
    %22 = arith.mulf %20, %21 : vector<6x64xf32>
    %cst_17 = arith.constant 1.600000e+01 : f32
    %23 = vector.broadcast %cst_17 : f32 to vector<6x64xf32>
    %24 = arith.divf %22, %23 : vector<6x64xf32>
    %25 = math.floor %24 : vector<6x64xf32>
    %cst_18 = arith.constant 1.600000e+01 : f32
    %26 = vector.broadcast %cst_18 : f32 to vector<6x64xf32>
    %27 = arith.divf %25, %26 : vector<6x64xf32>
    %cst_19 = arith.constant 5.000000e-01 : f32
    %28 = vector.broadcast %cst_19 : f32 to vector<6x64xf32>
    %29 = arith.subf %27, %28 : vector<6x64xf32>
    %c0_20 = arith.constant 0 : index
    %c0_21 = arith.constant 0 : index
    %c0_22 = arith.constant 0 : index
    %30 = vector.load %arg7[%c0_20, %c0_21, %c0_22] : memref<1x6x64xf32, #tpu.memory_space<vmem>>, vector<1x6x64xf32>
    %31 = vector.shape_cast %30 : vector<1x6x64xf32> to vector<6x64xf32>
    %32 = vector.shape_cast %29 : vector<6x64xf32> to vector<1x6x64xf32>
    tpu.vector_store %arg7[%c0_20, %c0_21, %c0_22], %32 {strides = array<i32>} : memref<1x6x64xf32, #tpu.memory_space<vmem>>, vector<1x6x64xf32>,
    return
  }
  func.func @transform_0(%arg0: i32) -> (i32, i32, i32) {
    %c0_i32 = arith.constant 0 : i32
    %c0_i32_0 = arith.constant 0 : i32
    %c0_i32_1 = arith.constant 0 : i32
    return %arg0, %c0_i32, %c0_i32_0 : i32, i32, i32
  }
  func.func @transform_1(%arg0: i32) -> (i32, i32) {
    %c0_i32 = arith.constant 0 : i32
    %c0_i32_0 = arith.constant 0 : i32
    %c0_i32_1 = arith.constant 0 : i32
    return %c0_i32, %c0_i32_0 : i32, i32
  }
  func.func @transform_2(%arg0: i32) -> (i32, i32) {
    %c0_i32 = arith.constant 0 : i32
    %c0_i32_0 = arith.constant 0 : i32
    %c0_i32_1 = arith.constant 0 : i32
    return %c0_i32, %c0_i32_0 : i32, i32
  }
  func.func @transform_3(%arg0: i32) -> (i32, i32) {
    %c0_i32 = arith.constant 0 : i32
    %c0_i32_0 = arith.constant 0 : i32
    %c0_i32_1 = arith.constant 0 : i32
    return %c0_i32, %c0_i32_0 : i32, i32
  }
  func.func @transform_4(%arg0: i32) -> (i32, i32) {
    %c0_i32 = arith.constant 0 : i32
    %c0_i32_0 = arith.constant 0 : i32
    %c0_i32_1 = arith.constant 0 : i32
    return %c0_i32, %c0_i32_0 : i32, i32
  }
  func.func @transform_5(%arg0: i32) -> (i32, i32, i32) {
    %c0_i32 = arith.constant 0 : i32
    %c0_i32_0 = arith.constant 0 : i32
    %c0_i32_1 = arith.constant 0 : i32
    return %arg0, %c0_i32, %c0_i32_0 : i32, i32, i32
  }
  func.func @transform_6(%arg0: i32) -> (i32, i32, i32) {
    %c0_i32 = arith.constant 0 : i32
    %c0_i32_0 = arith.constant 0 : i32
    %c0_i32_1 = arith.constant 0 : i32
    return %arg0, %c0_i32, %c0_i32_0 : i32, i32, i32
  }
}

</mosaic_0001>

<bundles_post_ra>
// kernel: tpu_custom_call.1
= control target key start
LH: loop header
LB: loop body
LE: loop exit
PB: predicated region body
PF: predicated region fallthrough
CT: control target
= control target key end

     0   :  { %12 = vsyncpa [#allocation3], 0  ;;  %s1046_s21 = smov 0   ;;  %s1135_s0 = inlined_call_operand.vmem [shape: f32[2,32,16], index: 0, kind: input, shape index: {}]   ;;  %s1136_s1 = inlined_call_operand.vmem [shape: f32[6,32], index: 1, kind: input, shape index: {}]   ;;  %s1137_s2 = inlined_call_operand.hbm [shape: f32[16,1024], index: 2, kind: input, shape index: {}]   ;;  %s1138_s3 = inlined_call_operand.vmem [shape: f32[16,64], index: 3, kind: input, shape index: {}]   ;;  %s1139_s4 = inlined_call_operand.vmem [shape: f32[6,1], index: 4, kind: input, shape index: {}]   ;;  %s1140_s5 = inlined_call_operand.vmem [shape: f32[2,6,1024], index: 5, kind: output, shape index: {0}]   ;;  %s1141_s6 = inlined_call_operand.vmem [shape: f32[2,6,64], index: 6, kind: output, shape index: {1}]  }
   0x1 LB: > { %s1052_s22 = sadd.s32 4294967295, %s1002_s21   ;;  %p861_p0 = scmp.ge.s32.totalorder %s1002_s21, 1  ;;  %s1002_s21 = sphi %s1046_s21, %s18_s21  }
   0x2   : > { %p185_p1 = scmp.lt.s32.totalorder %s1002_s21, 3  ;;  %s1004_s23 = smov [#allocation2]  }
   0x3   : > { %s200_s24 = sshll.u32 %s1004_s23, 4  ;;  %p1142_p3 = scmp.eq.s32.totalorder %s1052_s22, 0  ;;  %s201_s24 = int_to_ptr.vmem [resolvable:$true] %s200_s24 }
   0x4   : > { %p1056_p2 = pnand %p861_p0, %p185_p1  ;;  %s964_s29 = scalar_lea.hbm %s1137_s2, 2048 }
   0x5   : > { %p965_p6 = scmp.ne.s32.totalorder %s1137_s2, %s964_s29  ;;  %p971_p10 = scmp.lt.u32.totalorder %s964_s29, %s1137_s2 }
   0x6   : > { %s1144_s25 = scalar_select %p1056_p2, 1, 0 }
   0x7   : > { %p938_p4 = pneg %p1056_p2 }
   0x9   : > { %p1065_p5 = pnand %p1142_p3, %p938_p4 }
   0xb   : > { %p966_p7 = pneg %p1065_p5 }
   0xd   : > { %p967_p8 = pnand %p966_p7, %p965_p6 }
   0xf   : > { %p968_p9 = pneg %p967_p8 }
  0x11   : > { %p973_p11 = pnand %p971_p10, %p968_p9 }
  0x13   : > { %976 = shalt.err (!%p973_p11)
}
  0x14   : > { %s977_s10 = scalar_lea.vmem %s201_s24, 2048  ;;  %p985_p1 = scmp.lt.s32.totalorder %s201_s24, %s201_s24 }
  0x15   : > { %p978_p12 = scmp.ne.s32.totalorder %s201_s24, %s977_s10  ;;  %p986_p4 = scmp.lt.s32.totalorder %s977_s10, %s977_s10 }
  0x17   : > { %p980_p13 = pnand %p978_p12, %p966_p7  ;;  %p987_p3 = por %p986_p4, %p985_p1 }
  0x19   : > { %p981_p0 = pneg %p980_p13 }
  0x1b   : > { %p988_p2 = pnand %p987_p3, %p981_p0 }
  0x1d   : > { %991 = shalt.err (!%p988_p2)
}
  0x1e   : > { %s1005_s11 = smov 1024   ;;  %s1006_s12 = smov 64  }
  0x1f   : > { %941 = dma.hbm_to_vmem [thread:$0]  (!%p1065_p5), %s1137_s2, 2048, %s201_s24, [#allocation3], %s1005_s11, %s1005_s11, %s1006_s12  }
  0x20   : > { %p1146_p6 = scmp.ne.s32.totalorder %s1144_s25, 0 }
  0x21   : > { %p1147_p8 = scmp.eq.s32.totalorder (!%p1146_p6), %s1052_s22, 0 }
  0x22   : > { %230 = sbr.rel (%p1146_p6) target bundleno = 524 (0x20c), region = 40 }
  0x29   : > { %997 = dma.done.wait (%p1147_p8), [#allocation3], 2048   ;;  %p1148_p7 = pmov %p1147_p8 }
  0x2a   : > { %p264_p2 = scmp.lt.s32.totalorder %s1052_s22, 1  ;;  %v1007_v0 = vmov 0.0|0.0   ;;  %vm1008_vm0 = vmmov 0   ;;  %v1009_v1 = vmov 0.0   ;;  %v363_v7 = vld [vmem:[#allocation2 + $0x28] sm:$0xff]  ;;  %v358_v13 = vld [vmem:[#allocation2] sm:$0xff] }
  0x2b   : > { %999 = vsyncadd (%p1148_p7), [#allocation3], 4294965248  ;;  %909 = vmatprep.subr.bf16.mxu0 %v1007_v0  ;;  %899 = vmatprep.mubr.msk.f32.mxu0 %vm1008_vm0, %v1009_v1  ;;  %v371_v8 = vld [vmem:[#allocation2 + $0x68] sm:$0xff]  ;;  %v362_v15 = vld [vmem:[#allocation2 + $0x20] sm:$0xff]  ;;  %vm284_vm1 = vcmask 261120   ;;  %v1010_v25 = vmov 0  }
  0x2c   : > { %s1150_s22 = smov (!%p264_p2, %s1052_s22), 1  ;;  %447 = vmatprep.mubr.f32.mxu1 %v1009_v1  ;;  %v359_v9 = vld [vmem:[#allocation2 + $0x8] sm:$0xff]  ;;  %v923_v14 = vpack.c.bf16 %v371_v8, %v363_v7  ;;  %v370_v16 = vld [vmem:[#allocation2 + $0x60] sm:$0xff]  ;;  %v361_v21 = vld [vmem:[#allocation2 + $0x18] sm:$0xff]  ;;  %959 = vset.pattern.permute.xlu0 %v1010_v25  ;;  %vm379_vm2 = vcmask 130048   ;;  %vm759_vm3 = vcmask 521216  }
  0x2d   : > { %s881_s15 = sshll.u32 %s1150_s22, 5  ;;  %v367_v10 = vld [vmem:[#allocation2 + $0x48] sm:$0xff]  ;;  %v366_v17 = vld [vmem:[#allocation2 + $0x40] sm:$0xff]  ;;  %v925_v20 = vpack.c.bf16 %v370_v16, %v362_v15  ;;  %v369_v22 = vld [vmem:[#allocation2 + $0x58] sm:$0xff]  ;;  %s882_s29 = sshll.u32 %s1150_s22, 6 }
  0x2e   : > { %s268_s18 = scalar_lea.vmem %s1135_s0, %s881_s15  ;;  %v915_v12 = vpack.c.bf16 %v367_v10, %v359_v9  ;;  %v917_v18 = vpack.c.bf16 %v366_v17, %v358_v13  ;;  %v279_v19 = vld [vmem:[%s1136_s1] sm:$0x3f]  ;;  %v919_v23 = vpack.c.bf16 %v369_v22, %v361_v21  ;;  %v676_v27 = vld [vmem:[%s1138_s3 + $0x8] sm:$0xff]  ;;  %v360_v28 = vld [vmem:[#allocation2 + $0x10] sm:$0xff]  ;;  %s273_s8 = scalar_lea.vmem %s1140_s5, %s882_s29 }
  0x2f   : > { %v280_v2 = vld [vmem:[%s268_s18] sm:$0xff]  ;;  %v281_v3 = vld [vmem:[%s268_s18 + $0x8] sm:$0xff]  ;;  %v282_v4 = vld [vmem:[%s268_s18 + $0x10] sm:$0xff]  ;;  %s870_s9 = sshll.u32 %s1150_s22, 3 }
  0x30   : > { %v910_v5 = vpack.c.bf16 %v281_v3, %v280_v2  ;;  %v283_v6 = vld [vmem:[%s268_s18 + $0x18] sm:$0xff]  ;;  %916 = vmatprep.subr.bf16.mxu1 %v915_v12  ;;  %v278_v24 = vld [vmem:[%s1139_s4] sm:$0x3f]  ;;  %v368_v29 = vld [vmem:[#allocation2 + $0x50] sm:$0xff]  ;;  %s277_s12 = scalar_lea.vmem %s1141_s6, %s870_s9 }
  0x31   : > { %v913_v11 = vpack.c.bf16 %v283_v6, %v282_v4  ;;  %918 = vmatpush1.bf16.msra.mxu1 %v917_v18  ;;  %376 = vperm.xlu0 %959, %v278_v24   ;;  %v675_v26 = vld [vmem:[%s1138_s3] sm:$0xff]  ;;  %v365_v30 = vld [vmem:[#allocation2 + $0x38] sm:$0xff]  ;;  %v921_v33 = vpack.c.bf16 %v368_v29, %v360_v28  ;;  %v364_v34 = vld [vmem:[#allocation2 + $0x30] sm:$0xff] }
  0x32   : > { %911 = vmatpush3.bf16.msra.mxu0 %v910_v5  ;;  %920 = vmatprep.subr.bf16.mxu1 %v919_v23  ;;  %v373_v31 = vld [vmem:[#allocation2 + $0x78] sm:$0xff]  ;;  %v932_v32 = vpack.c.bf16 %v676_v27, %v675_v26  ;;  %v372_v35 = vld [vmem:[#allocation2 + $0x70] sm:$0xff] }
  0x33   : > { %912 = vmatprep.subr.bf16.mxu0 %v1007_v0  ;;  %v927_v37 = vpack.c.bf16 %v373_v31, %v365_v30  ;;  %v929_v39 = vpack.c.bf16 %v372_v35, %v364_v34 }
  0x36   : > { %914 = vmatpush3.bf16.msra.mxu0 %v913_v11 }
  0x37   : > { %924 = vmatprep.subr.bf16.mxu0 %v923_v14 }
  0x39   : > { %900 = vmatmul.mubr.msk.f32.vlgmr.msra.gmra.mrb[0].mxu0 %vm284_vm1, %v279_v19 }
  0x3a   : > { %926 = vmatpush1.bf16.msra.mxu0 %v925_v20  ;;  %589 = vmatprep.mubr.f32.mxu0 %v1009_v1 }
  0x3b   : > { %931 = vmatprep.subr.bf16.mxu0 %v1007_v0 }
  0xb0   : > { %v377_v40 = vpop.permute.xlu0 %376 }
 0x10c   : > { %v354_v36 = vpop.f32.mrb[0].mxu0 }
 0x10d   : > { %v901_v38 = vpop.f32.mrb[1].mxu0  ;;  %872 = vmatmul.mubr.msk.f32.vlgmr.msra.gmra.mrb[0].mxu1 %vm379_vm2, %v354_v36  ;;  %874 = vmatmul.mubr.msk.f32.vlgmr.msra.gmra.mrb[2].mxu0 %vm379_vm2, %v354_v36 }
 0x10e   : > { %933 = vmatpush3.bf16.msra.mxu0 %v932_v32  ;;  %922 = vmatpush1.bf16.msra.mxu1 %v921_v33 }
 0x10f   : > { %518 = vmatprep.mubr.f32.mxu1 %v1009_v1  ;;  %906 = vmatprep.mubr.msk.f32.mxu0 %vm1008_vm0, %v1009_v1 }
 0x110   : > { %928 = vmatprep.subr.bf16.mxu1 %v927_v37 }
 0x111   : > { %873 = vmatmul.mubr.msk.f32.vlgmr.msra.gmra.mrb[2].mxu1 %vm379_vm2, %v354_v36  ;;  %907 = vmatmul.mubr.msk.f32.vlgmr.msra.gmra.mrb[4].mxu0 %vm379_vm2, %v354_v36 }
 0x112   : > { %930 = vmatpush1.bf16.msra.mxu1 %v929_v39  ;;  %660 = vmatprep.mubr.f32.mxu1 %v1009_v1 }
 0x115   : > { %875 = vmatmul.mubr.msk.f32.vlgmr.msra.gmra.mrb[4].mxu1 %vm379_vm2, %v354_v36 }
 0x1e0   : > { %v449_v41 = vpop.f32.mrb[0].mxu1  ;;  %v591_v42 = vpop.f32.mrb[2].mxu0 }
 0x1e1   : > { %v450_v43 = vadd.f32 %v449_v41, %v377_v40  ;;  %v592_v44 = vadd.f32 %v591_v42, %v377_v40  ;;  %v451_v45 = vpop.f32.mrb[1].mxu1  ;;  %v593_v46 = vpop.f32.mrb[3].mxu0 }
 0x1e2   : > { %v452_v47 = vadd.f32 %v451_v45, %v377_v40  ;;  %v594_v48 = vadd.f32 %v593_v46, %v377_v40 }
 0x1e3   : > { %667 = vst [vmem:[%s273_s8] sm:$0x3f] %v450_v43  ;;  %671 = vst [vmem:[%s273_s8 + $0x20] sm:$0x3f] %v592_v44 }
 0x1e4   : > { %668 = vst [vmem:[%s273_s8 + $0x8] sm:$0x3f] %v452_v47  ;;  %672 = vst [vmem:[%s273_s8 + $0x28] sm:$0x3f] %v594_v48  ;;  %v520_v49 = vpop.f32.mrb[2].mxu1  ;;  %v743_v50 = vpop.f32.mrb[4].mxu0 }
 0x1e5   : > { %v521_v51 = vadd.f32 %v520_v49, %v377_v40  ;;  %v744_v52 = vadd.f32 %v743_v50, %v377_v40  ;;  %v522_v53 = vpop.f32.mrb[3].mxu1  ;;  %v908_v54 = vpop.f32.mrb[5].mxu0 }
 0x1e6   : > { %v523_v55 = vadd.f32 %v522_v53, %v377_v40 }
 0x1e7   : > { %669 = vst [vmem:[%s273_s8 + $0x10] sm:$0x3f] %v521_v51  ;;  %v877_v56 = vmul.f32 -1.442695, %v744_v52 }
 0x1e8   : > { %670 = vst [vmem:[%s273_s8 + $0x18] sm:$0x3f] %v523_v55  ;;  %v662_v57 = vpop.f32.mrb[4].mxu1 }
 0x1e9   : > { %960 = vpow2.f32 %v877_v56  ;;  %v663_v58 = vadd.f32 %v662_v57, %v377_v40  ;;  %v664_v59 = vpop.f32.mrb[5].mxu1 }
 0x1ea   : > { %v665_v60 = vadd.f32 %v664_v59, %v377_v40 }
 0x1eb   : > { %673 = vst [vmem:[%s273_s8 + $0x30] sm:$0x3f] %v663_v58 }
 0x1ec   : > { %674 = vst [vmem:[%s273_s8 + $0x38] sm:$0x3f] %v665_v60 }
 0x1f3   : > { %v961_v61 = vpop.eup %960 }
 0x1f4   : > { %v750_v62 = vadd.f32 1.0, %v961_v61 }
 0x1f6   : > { %962 = vrcp.f32 %v750_v62 }
 0x200   : > { %v963_v63 = vpop.eup %962 }
 0x201   : > { %v753_v0 = vmul.f32 255.0, %v963_v63 }
 0x203   : > { %v755_v1 = vmul.f32 0.0625, %v753_v0 }
 0x205   : > { %v756_v2 = vfloor.f32 %v755_v1 }
 0x207   : > { %v757_v3 = vmul.f32 0.0625, %v756_v2 }
 0x209   : > { %v878_v4 = vadd.f32 -0.5, %v757_v3 }
 0x20b   : > { %760 = vst.msk [vmem:[%s277_s12] sm:$0x3f] %vm759_vm3, %v878_v4 }
 0x20c PF: > { %s18_s21 = sadd.s32 1, %s1002_s21  }
 0x20d   : > { %p15_p3 = scmp.ge.s32.totalorder %s18_s21, 4  }
 0x20f   :  { %17 = sbr.rel (!%p15_p3) target bundleno = 1 (0x1), region = 87 }
 0x216   :  { %796 = vsyncpa [#allocation3], 1 }
 0x217   :  { %798 = vsyncpa [#allocation3 + $0x1], 1 }

</bundles_post_ra>
